<compile_context>
chip_gen: v6e
topology: v6e:2x2x1
jax: 0.10.0
libtpu: 0.0.40
codegen_flags: <defaults>
</compile_context>

<pallas_src>
import math

import jax
import jax.numpy as jnp
from jax.experimental import pallas as pl
from jax.experimental.pallas import tpu as pltpu


def _sinpos_kernel(freq_phase_ref, out_ref):
    # out_ref:        (TILE_S, dim) block of the (1, seq_len, dim) output
    #                 (leading size-1 dim squeezed away by the BlockSpec).
    # freq_phase_ref: (2, dim) f32, resident across all grid steps:
    #                 row 0 = [inv_freq, inv_freq], row 1 = [0, pi/2].
    tile_s, dim = out_ref.shape

    # Absolute position of the first row of this seq tile.
    row0 = (pl.program_id(0) * tile_s).astype(jnp.float32)
    t = row0 + jax.lax.broadcasted_iota(jnp.int32, (tile_s, dim), 0).astype(
        jnp.float32)

    inv_freq_full = freq_phase_ref[0:1, :]   # (1, dim)
    phase = freq_phase_ref[1:2, :]           # (1, dim)

    # arg = t * inv_freq (duplicated) + phase; cos(x) == sin(x + pi/2).
    arg = t * inv_freq_full + phase          # VPU broadcast FMA
    # Single lane-dense full-width store (EUP sin, cast at store).
    out_ref[...] = jnp.sin(arg).astype(out_ref.dtype)


def _round_up(v, m):
    return ((v + m - 1) // m) * m


def sinusoidal_positional_embedding(x, dim, seq_dim=1, base=10000.0,
                                    precision=jnp.float16):
    """JAX/Pallas equivalent of SinusoidalPositionalEmbedding.forward.

    Matches PyTorch semantics: with precision == half (the default) the math
    is done in float32 and the result *stays* float32; with
    precision == bfloat16 the sin/cos are computed in float32 and cast to
    bfloat16 at the store.  Returns an array of shape (1, seq_len, dim).
    """
    assert dim % 2 == 0, "dim must be even (sin/cos halves)"
    seq_len = x.shape[seq_dim]
    half = dim // 2
    # f32 position index is exact only up to 2**24.
    assert seq_len < (1 << 24), "seq_len too large for exact f32 positions"

    out_dtype = jnp.bfloat16 if precision == jnp.bfloat16 else jnp.float32
    out_bytes = jnp.dtype(out_dtype).itemsize

    # Buffer from __init__: inv_freq = 1 / base ** (arange(0, dim, 2) / dim),
    # duplicated across both halves, plus the sin->cos phase shift table.
    inv_freq = 1.0 / (base ** (jnp.arange(0, dim, 2, dtype=jnp.float32) / dim))
    inv_freq_full = jnp.concatenate([inv_freq, inv_freq])                # (dim,)
    phase = jnp.concatenate(
        [jnp.zeros((half,), jnp.float32),
         jnp.full((half,), jnp.float32(math.pi / 2.0))])                 # (dim,)
    freq_phase = jnp.stack([inv_freq_full, phase], axis=0)               # (2,dim)

    # Tile seq_len: biggest multiple-of-8 row count whose double-buffered
    # output tiles plus ~2 f32 temporaries fit a ~24 MiB working-set budget
    # (well under the 32 MiB scoped VMEM requested below, safe on all of
    # v5e/v6e/v7x).
    vmem_budget = 24 * 1024 * 1024
    per_row_bytes = dim * (2 * out_bytes + 2 * 4)   # 2 out buffers + 2 f32 temps
    rows_budget = max(8, (vmem_budget // per_row_bytes) // 8 * 8)
    seq_pad = _round_up(seq_len, 8)
    tile_s = min(rows_budget, seq_pad)

    # v7x has 2 TensorCores per chip; a single-step grid leaves one idle.
    # Split any non-trivial output into at least 2 parallel tiles.
    if tile_s >= seq_pad and seq_len * dim * out_bytes > (1 << 20):
        tile_s = max(8, _round_up(pl.cdiv(seq_len, 2), 8))
    grid = (pl.cdiv(seq_len, tile_s),)

    cost = pl.CostEstimate(
        flops=2 * seq_len * dim,                 # one mul + one add per element
        transcendentals=seq_len * dim,           # one sin per output element
        bytes_accessed=seq_len * dim * out_bytes + 2 * dim * 4,
    )

    emb = pl.pallas_call(
        _sinpos_kernel,
        out_shape=jax.ShapeDtypeStruct((1, seq_len, dim), out_dtype),
        grid=grid,
        in_specs=[pl.BlockSpec((2, dim), lambda i: (0, 0))],
        out_specs=pl.BlockSpec((pl.Squeezed(), tile_s, dim),
                               lambda i: (0, i, 0)),
        compiler_params=pltpu.CompilerParams(
            dimension_semantics=("parallel",),   # shard rows over v7x's 2 TCs
            vmem_limit_bytes=32 * 1024 * 1024,
        ),
        cost_estimate=cost,
    )(freq_phase)
    return emb


def _reference(x, dim, seq_dim=1, base=10000.0, precision=jnp.float16):
    # Pure-JAX reference mirroring the PyTorch forward.
    seq_len = x.shape[seq_dim]
    inv_freq = 1.0 / (base ** (jnp.arange(0, dim, 2, dtype=jnp.float32) / dim))
    t = jnp.arange(seq_len, dtype=jnp.float32)
    sinusoid_inp = jnp.einsum("i,j->ij", t, inv_freq)
    sin, cos = jnp.sin(sinusoid_inp), jnp.cos(sinusoid_inp)
    if precision == jnp.bfloat16:
        sin, cos = sin.astype(jnp.bfloat16), cos.astype(jnp.bfloat16)
    emb = jnp.concatenate([sin, cos], axis=-1)
    return emb[None, :, :]


if __name__ == "__main__":
    key = jax.random.PRNGKey(0)

    # x only supplies the sequence length via x.shape[seq_dim]
    batch, seq, hidden = 2, 8, 32
    x = jax.random.normal(key, (batch, seq, hidden), dtype=jnp.float32)

    dim = hidden
    out = jax.block_until_ready(sinusoidal_positional_embedding(x, dim, seq_dim=1))
    ref = _reference(x, dim, seq_dim=1)
    assert out.shape == (1, seq, dim), out.shape
    assert out.dtype == jnp.float32, out.dtype
    assert jnp.allclose(out, ref, atol=1e-5, rtol=1e-5), "mismatch vs reference (f32)"

    # Exercise the tiled / partial-last-block path and the bfloat16 branch.
    seq2, dim2 = 200, 256
    x2 = jax.random.normal(key, (1, seq2, dim2), dtype=jnp.float32)
    out2 = jax.block_until_ready(
        sinusoidal_positional_embedding(x2, dim2, seq_dim=1,
                                        precision=jnp.bfloat16))
    ref2 = _reference(x2, dim2, seq_dim=1, precision=jnp.bfloat16)
    assert out2.shape == (1, seq2, dim2), out2.shape
    assert out2.dtype == jnp.bfloat16, out2.dtype
    assert jnp.allclose(out2.astype(jnp.float32), ref2.astype(jnp.float32),
                        atol=2e-2, rtol=2e-2), "mismatch vs reference (bf16)"

    print("KERNEL_OK")
</pallas_src>

<mosaic_0001>
module attributes {stable_mosaic.version = 11 : i64} {
  func.func @_sinpos_kernel(%arg0: i32, %arg1: memref<2x32xf32, #tpu.memory_space<vmem>>, %arg2: memref<1x8x32xf32, #tpu.memory_space<vmem>>) attributes {dimension_semantics = [#tpu.dimension_semantics<parallel>], iteration_bounds = array<i64: 1>, scalar_prefetch = 0 : i64, scratch_operands = 0 : i64, tpu.core_type = #tpu.core_type<tc>, window_params = [{pipeline_mode = #tpu.pipeline_mode<synchronous>, transform_indices = @transform_0, window_bounds = array<i64: 2, 32>}, {transform_indices = @transform_1, window_bounds = array<i64: 1, 8, 32>}]} {
    %c8_i32 = arith.constant 8 : i32
    %0 = arith.muli %arg0, %c8_i32 : i32
    %1 = arith.sitofp %0 : i32 to f32
    %2 = tpu.iota {dimensions = array<i32: 0>} : vector<8x32xi32>
    %3 = arith.sitofp %2 : vector<8x32xi32> to vector<8x32xf32>
    %4 = vector.broadcast %1 : f32 to vector<8x32xf32>
    %5 = arith.addf %4, %3 : vector<8x32xf32>
    %c0 = arith.constant 0 : index
    %c0_0 = arith.constant 0 : index
    %6 = vector.load %arg1[%c0, %c0_0] : memref<2x32xf32, #tpu.memory_space<vmem>>, vector<1x32xf32>
    %c1 = arith.constant 1 : index
    %c0_1 = arith.constant 0 : index
    %7 = vector.load %arg1[%c1, %c0_1] : memref<2x32xf32, #tpu.memory_space<vmem>>, vector<1x32xf32>
    %8 = vector.broadcast %6 : vector<1x32xf32> to vector<8x32xf32>
    %9 = arith.mulf %5, %8 : vector<8x32xf32>
    %10 = vector.broadcast %7 : vector<1x32xf32> to vector<8x32xf32>
    %11 = arith.addf %9, %10 : vector<8x32xf32>
    %12 = math.sin %11 : vector<8x32xf32>
    %c0_2 = arith.constant 0 : index
    %c0_3 = arith.constant 0 : index
    %c0_4 = arith.constant 0 : index
    %13 = vector.load %arg2[%c0_2, %c0_3, %c0_4] : memref<1x8x32xf32, #tpu.memory_space<vmem>>, vector<1x8x32xf32>
    %14 = vector.shape_cast %13 : vector<1x8x32xf32> to vector<8x32xf32>
    %15 = vector.shape_cast %12 : vector<8x32xf32> to vector<1x8x32xf32>
    tpu.vector_store %arg2[%c0_2, %c0_3, %c0_4], %15 {strides = array<i32>} : memref<1x8x32xf32, #tpu.memory_space<vmem>>, vector<1x8x32xf32>,
    return
  }
  func.func @transform_0(%arg0: i32) -> (i32, i32) {
    %c0_i32 = arith.constant 0 : i32
    %c0_i32_0 = arith.constant 0 : i32
    %c0_i32_1 = arith.constant 0 : i32
    return %c0_i32, %c0_i32_0 : i32, i32
  }
  func.func @transform_1(%arg0: i32) -> (i32, i32, i32) {
    %c0_i32 = arith.constant 0 : i32
    %c0_i32_0 = arith.constant 0 : i32
    %c0_i32_1 = arith.constant 0 : i32
    return %c0_i32, %arg0, %c0_i32_0 : i32, i32, i32
  }
}

</mosaic_0001>

<bundles_post_ra>
// kernel: tpu_custom_call.1
= control target key start
LH: loop header
LB: loop body
LE: loop exit
PB: predicated region body
PF: predicated region fallthrough
CT: control target
= control target key end

     0   :  { %6 = vsyncpa [#allocation3], 0  ;;  %s272_s0 = inlined_call_operand.hbm [shape: f32[2,32], index: 0, kind: input, shape index: {}]   ;;  %s273_s1 = inlined_call_operand.hbm [shape: f32[1,8,32], index: 1, kind: output, shape index: {}]  }
   0x1   :  { %7 = vsyncpa [#allocation4], 0  ;;  %s227_s6 = smov [#allocation2]  }
   0x2   :  { %s14_s7 = sshll.u32 %s227_s6, 4  ;;  %s15_s7 = int_to_ptr.vmem [resolvable:$true] %s14_s7 }
   0x3   :  { %s191_s8 = scalar_lea.vmem %s15_s7, 32  ;;  %p196_p1 = scmp.lt.s32.totalorder %s15_s7, %s15_s7 }
   0x4   :  { %p192_p0 = scmp.ne.s32.totalorder %s15_s7, %s191_s8  ;;  %p197_p2 = scmp.lt.s32.totalorder %s191_s8, %s191_s8 }
   0x6   :  { %p198_p3 = por %p197_p2, %p196_p1 }
   0x8   :  { %p199_p4 = pnand %p198_p3, %p192_p0 }
   0xa   :  { %202 = shalt.err (!%p199_p4)
}
   0xb   :  { %17 = dma.hbm_to_vmem [thread:$0]  %s272_s0, 32, %s15_s7, [#allocation3]  }
   0xc   :  { %223 = dma.done.wait [#allocation3], 32  }
   0xd   :  { %224 = vsyncadd [#allocation3], 4294967264  ;;  %v23_v0 = vlaneseq  ;;  %v161_v3 = vld [vmem:[#allocation2] ss:$0 sm:$0xff]  ;;  %v162_v4 = vld [vmem:[#allocation2 + $0x1] ss:$0 sm:$0xff] }
   0xe   :  { %v228_v18 = vmov 683565275   ;;  %v229_v20 = vmov 2475754826   ;;  %v230_v22 = vmov 2131351028  }
   0xf   :  { %v24_v1 = vshrl.u32 %v23_v0, 7  ;;  %v231_v24 = vmov 2102212464   ;;  %v232_v26 = vmov 920167782   ;;  %s234_s0 = smov [#allocation5]  }
  0x10   :  { %v233_v33 = vmov 1326507024   ;;  %s152_s11 = sshll.u32 %s234_s0, 4  ;;  %vm144_vm13 = vcmask 261120   ;;  %s153_s11 = int_to_ptr.vmem [resolvable:$true] %s152_s11 }
  0x11   :  { %v25_v2 = vcvt.s32.f32 %v24_v1  ;;  %s203_s12 = scalar_lea.vmem %s153_s11, 128  ;;  %p208_p6 = scmp.lt.s32.totalorder %s153_s11, %s153_s11 }
  0x12   :  { %p204_p5 = scmp.ne.s32.totalorder %s153_s11, %s203_s12  ;;  %p209_p7 = scmp.lt.s32.totalorder %s203_s12, %s203_s12 }
  0x13   :  { %v34_v5 = vmul.f32 %v161_v3, %v25_v2 }
  0x14   :  { %p210_p8 = por %p209_p7, %p208_p6 }
  0x15   :  { %v248_v6 = vadd.f32 %v162_v4, %v34_v5 }
  0x16   :  { %p211_p9 = pnand %p210_p8, %p204_p5 }
  0x17   :  { %v43_v7 = vand.u32 2139095040, %v248_v6  ;;  %v40_v9 = vand.u32 2147483647, %v248_v6  ;;  %vm42_vm7 = vcmp.lt.s32.totalorder %v248_v6, 0  ;;  %vm132_vm12 = vweird.f32 %v248_v6 }
  0x19   :  { %v44_v8 = vshrl.u32 %v43_v7, 23  ;;  %v47_v12 = vand.u32 8388607, %v40_v9  ;;  %vm41_vm8 = vcmp.le.f32.partialorder %v40_v9, 0.7853982 }
  0x1b   :  { %v163_v10 = vadd.s32 4294967169, %v44_v8  ;;  %v48_v15 = vor.u32 8388608, %v47_v12 }
  0x1d   :  { %v50_v11 = vadd.s32 1, %v163_v10  ;;  %v88_v35 = vshll.u32 %v48_v15, 8 }
  0x1f   :  { %vm51_vm0 = vcmp.gt.s32.totalorder %v50_v11, 0 }
  0x20   :  { %v52_v13 = vsel %vm51_vm0, %v50_v11, 0 }
  0x21   :  { %v54_v14 = vand.u32 31, %v52_v13  ;;  %v53_v16 = vshrl.u32 %v52_v13, 5 }
  0x23   :  { %v55_v17 = vsub.s32 32, %v54_v14  ;;  %v57_v19 = vshll.u32 %v228_v18, %v54_v14  ;;  %v60_v21 = vshll.u32 %v229_v20, %v54_v14  ;;  %v63_v23 = vshll.u32 %v230_v22, %v54_v14 }
  0x24   :  { %v66_v25 = vshll.u32 %v231_v24, %v54_v14  ;;  %v69_v27 = vshll.u32 %v232_v26, %v54_v14  ;;  %vm72_vm1 = vcmp.lt.s32.totalorder %v53_v16, 1  ;;  %vm75_vm2 = vcmp.lt.s32.totalorder %v53_v16, 4 }
  0x25   :  { %v56_v28 = vshrl.u32 %v228_v18, %v55_v17  ;;  %v58_v29 = vshrl.u32 %v229_v20, %v55_v17  ;;  %v61_v30 = vshrl.u32 %v230_v22, %v55_v17  ;;  %v64_v31 = vshrl.u32 %v231_v24, %v55_v17 }
  0x26   :  { %v67_v32 = vshrl.u32 %v232_v26, %v55_v17  ;;  %v70_v34 = vshrl.u32 %v233_v33, %v55_v17  ;;  %vm73_vm3 = vcmp.lt.s32.totalorder %v53_v16, 2  ;;  %vm74_vm4 = vcmp.lt.s32.totalorder %v53_v16, 3 }
  0x27   :  { %v59_v36 = vor.u32 %v58_v29, %v57_v19  ;;  %v62_v37 = vor.u32 %v61_v30, %v60_v21  ;;  %v65_v38 = vor.u32 %v64_v31, %v63_v23 }
  0x28   :  { %v68_v39 = vor.u32 %v67_v32, %v66_v25  ;;  %v71_v40 = vor.u32 %v70_v34, %v69_v27 }
  0x29   :  { %v76_v41 = vsel %vm72_vm1, %v56_v28, %v59_v36  ;;  %v77_v42 = vsel %vm75_vm2, %v65_v38, 2102212464  ;;  %v80_v43 = vsel %vm72_vm1, %v59_v36, %v62_v37  ;;  %v84_v44 = vsel %vm72_vm1, %v62_v37, %v65_v38 }
  0x2a   :  { %v78_v45 = vsel %vm74_vm4, %v62_v37, %v77_v42  ;;  %v81_v46 = vsel %vm75_vm2, %v68_v39, 920167782  ;;  %v85_v47 = vsel %vm75_vm2, %v71_v40, 1326507024 }
  0x2b   :  { %v82_v48 = vsel %vm74_vm4, %v65_v38, %v81_v46  ;;  %v86_v49 = vsel %vm74_vm4, %v68_v39, %v85_v47  ;;  %v79_v50 = vsel %vm73_vm3, %v76_v41, %v78_v45 }
  0x2c   :  { %v83_v51 = vsel %vm73_vm3, %v80_v43, %v82_v48  ;;  %v87_v52 = vsel %vm73_vm3, %v84_v44, %v86_v49  ;;  %v95_v57 = vmul.u32 %v88_v35, %v79_v50 }
  0x2d   :  { %v254_v53 = vmul.u32.u64.low %v88_v35, %v87_v52  ;;  %v255_v54 = vmul.u32.u64.high %v88_v35, %v87_v52, %v254_v53  ;;  %v257_v55 = vmul.u32.u64.low %v88_v35, %v83_v51  ;;  %v258_v56 = vmul.u32.u64.high %v88_v35, %v83_v51, %v257_v55 }
  0x2f   :  { %vm97_vm5 = vc.u32 %v255_v54, %v257_v55  ;;  %v98_v58 = vadd.s32 1, %v258_v56  ;;  %v96_v5 = vadd.s32 %v257_v55, %v255_v54 }
  0x31   :  { %v99_v59 = vsel %vm97_vm5, %v98_v58, %v258_v56 }
  0x32   :  { %v100_v60 = vadd.s32 %v99_v59, %v95_v57 }
  0x34   :  { %v101_v61 = vadd.s32 536870912, %v100_v60 }
  0x36   :  { %v102_v62 = vshrl.u32 %v101_v61, 30 }
  0x38   :  { %v103_v63 = vshll.u32 %v102_v62, 30  ;;  %v126_v20 = vsub.s32 4, %v102_v62 }
  0x3a   :  { %v104_v0 = vsub.s32 %v100_v60, %v103_v63  ;;  %v127_v23 = vsel %vm42_vm7, %v126_v20, %v102_v62 }
  0x3b   :  { %v129_v25 = vsel %vm41_vm8, 0, %v127_v23 }
  0x3c   :  { %v106_v1 = vsub.s32 0, %v104_v0  ;;  %v133_v26 = vadd.s32 3, %v129_v25 }
  0x3e   :  { %v164_v2 = vmin.u32 %v106_v1, %v104_v0  ;;  %v134_v27 = vand.u32 3, %v133_v26 }
  0x40   :  { %v108_v3 = vclz %v164_v2  ;;  %vm139_vm9 = vcmp.eq.s32.totalorder %v134_v27, 2  ;;  %vm136_vm10 = vcmp.eq.s32.totalorder %v134_v27, 0  ;;  %vm135_vm11 = vcmp.lt.s32.totalorder %v134_v27, 2 }
  0x42   :  { %v165_v4 = vadd.s32 4294967294, %v108_v3 }
  0x44   :  { %vm166_vm6 = vcmp.lt.s32.totalorder %v165_v4, 0 }
  0x45   :  { %v111_v7 = vsel %vm166_vm6, 0, %v165_v4 }
  0x46   :  { %v112_v8 = vsub.s32 32, %v111_v7  ;;  %v113_v10 = vshll.u32 %v104_v0, %v111_v7  ;;  %v116_v11 = vsub.s32 4294967266, %v111_v7 }
  0x48   :  { %v114_v12 = vshrl.u32 %v96_v5, %v112_v8  ;;  %v117_v13 = vadd.s32 127, %v116_v11 }
  0x4a   :  { %v115_v14 = vor.u32 %v114_v12, %v113_v10  ;;  %v118_v15 = vshll.u32 %v117_v13, 23 }
  0x4c   :  { %v119_v16 = vor.u32 4788187, %v118_v15  ;;  %v122_v17 = vcvt.s32.f32 %v115_v14 }
  0x4e   :  { %v120_v18 = vand.u32 2147483647, %v119_v16 }
  0x50   :  { %v123_v19 = vmul.f32 %v122_v17, %v120_v18 }
  0x52   :  { %v124_v21 = vxor.u32 2147483648, %v123_v19 }
  0x54   :  { %v125_v22 = vsel %vm42_vm7, %v124_v21, %v123_v19 }
  0x55   :  { %v128_v24 = vsel %vm41_vm8, %v248_v6, %v125_v22 }
  0x56   :  { %179 = vcosq.f32 %v128_v24 }
  0x57   :  { %181 = vsinq.f32 %v128_v24 }
  0x63   :  { %v180_v28 = vpop.eup %179 }
  0x64   :  { %v182_v29 = vpop.eup %181  ;;  %v140_v30 = vxor.u32 2147483648, %v180_v28 }
  0x65   :  { %v137_v31 = vxor.u32 2147483648, %v182_v29 }
  0x66   :  { %v141_v9 = vsel %vm139_vm9, %v140_v30, %v182_v29 }
  0x67   :  { %v138_v32 = vsel %vm136_vm10, %v180_v28, %v137_v31 }
  0x68   :  { %v142_v33 = vsel %vm135_vm11, %v138_v32, %v141_v9 }
  0x69   :  { %v143_v34 = vsel %vm132_vm12, nan, %v142_v33 }
  0x6a   :  { %145 = vst.msk [vmem:[#allocation5] sm:$0xff] %vm144_vm13, %v143_v34 }
  0x6b   :  { %214 = shalt.err (!%p211_p9)
}
  0x6c   :  { %155 = dma.vmem_to_hbm [thread:$0]  %s153_s11, 128, %s273_s1, [#allocation4]  }
  0x6d   :  { %225 = dma.done.wait [#allocation4], 128  }
  0x6e   :  { %226 = vsyncadd [#allocation4], 4294967168 }
  0x6f   :  { %159 = vsyncpa [#allocation3], 1 }
  0x70   :  { %160 = vsyncpa [#allocation4], 1 }

</bundles_post_ra>
